<compile_context>
chip_gen: v5e
topology: v5e:2x2
jax: 0.10.0
libtpu: 0.0.40
codegen_flags: <defaults>
</compile_context>

<pallas_src>
import jax
import jax.numpy as jnp
from jax.experimental import pallas as pl
from jax.experimental.pallas import tpu as pltpu


def _round_down_multiple(x, m):
    return (x // m) * m


def _sublane_multiple(dtype):
    # Dtype-native packed sublane tile: f32 -> 8, bf16/f16 -> 16, int8/fp8 -> 32.
    return {4: 8, 2: 16, 1: 32}.get(jnp.dtype(dtype).itemsize, 8)


def _chip_generation():
    """Best-effort TPU generation detection; falls back to conservative settings."""
    try:
        kind = jax.devices()[0].device_kind.lower()
    except Exception:
        return "unknown"
    if "v7" in kind or "7x" in kind:
        return "v7x"
    if "v6" in kind:
        return "v6e"
    if "v5" in kind:
        return "v5e"
    return "unknown"


def _fbn_kernel(x_ref, sb_ref, o_ref):
    # Elementwise hot path: y = x * scale + shift, per-row scale/shift broadcast
    # along the lane (H*W) axis.
    sb = sb_ref[...]                              # (tile_r, 2) f32
    scale = sb[:, 0:1]
    shift = sb[:, 1:2]
    x = x_ref[...].astype(jnp.float32)
    o_ref[...] = (x * scale + shift).astype(o_ref.dtype)


def _make_fold_kernel(k):
    # k channels folded into each row: expand per-channel scale/shift along the
    # lane axis with a small one-hot matmul (exact: each output lane picks one
    # input), then the same FMA.  The matmul rides in MXU slack (HBM-bound op).
    def kernel(x_ref, sb_ref, e_ref, o_ref):
        sb = sb_ref[...]                          # (tile_r, 2k) f32
        e = e_ref[...]                            # (k, k*HW)    f32 one-hot expander
        scale_e = jnp.dot(sb[:, :k], e, preferred_element_type=jnp.float32)
        shift_e = jnp.dot(sb[:, k:], e, preferred_element_type=jnp.float32)
        x = x_ref[...].astype(jnp.float32)
        o_ref[...] = (x * scale_e + shift_e).astype(o_ref.dtype)
    return kernel


def _choose_fold_factor(rows, cols, max_lanes=2048):
    """Pick k (divisor of rows) with k*cols >= 128 lanes, maximizing lane density."""
    if cols >= 128:
        return 1
    best_k, best_util = 1, 0.0
    for k in range(2, rows + 1):
        if rows % k:
            continue
        w = k * cols
        if w > max_lanes:
            break
        if w < 128:
            continue
        util = w / (pl.cdiv(w, 128) * 128)
        if util > best_util + 1e-9:
            best_util, best_k = util, k
    return best_k if best_util > 0.0 else 1


def frozen_batch_norm_2d(x, weight, bias, running_mean, running_var, eps=1e-5):
    """x: (N, C, H, W); weight/bias/running_mean/running_var: (C,)."""
    N, C, H, W = x.shape
    rows, cols = N * C, H * W
    isz = jnp.dtype(x.dtype).itemsize
    sub = _sublane_multiple(x.dtype)
    gen = _chip_generation()

    # ---- Generation-aware budgets. ----
    if gen == "v7x":
        target_block_bytes = 6 * 1024 * 1024    # amortize ~0.35us/step at 3.2 TB/s
        vmem_limit = 40 * 1024 * 1024           # stay well inside 64 MiB physical
        num_cores = 2                           # 2 TensorCores per chip
    else:                                        # v5e / v6e / unknown
        target_block_bytes = 2 * 1024 * 1024    # measured 85%+ of HBM roofline
        vmem_limit = 32 * 1024 * 1024
        num_cores = 1

    # Per-channel affine params (tiny JAX glue) in f32 for precision.
    scale = weight.astype(jnp.float32) * jax.lax.rsqrt(
        running_var.astype(jnp.float32) + eps)                        # (C,)
    shift = bias.astype(jnp.float32) - running_mean.astype(jnp.float32) * scale
    scale_rows = jnp.tile(scale, N)                                   # row = n*C + c
    shift_rows = jnp.tile(shift, N)

    # ---- Lane-folding for small feature maps (H*W < 128). ----
    k = _choose_fold_factor(rows, cols)
    if k > 1:
        rows_k, cols_k = rows // k, k * cols
        x2d = x.reshape(rows_k, cols_k)
        sb = jnp.concatenate(
            [scale_rows.reshape(rows_k, k), shift_rows.reshape(rows_k, k)], axis=1)
        # One-hot expander: E[i, i*HW : (i+1)*HW] = 1.
        expand = jnp.repeat(jnp.eye(k, dtype=jnp.float32), cols, axis=1)   # (k, cols_k)
        kernel = _make_fold_kernel(k)
    else:
        rows_k, cols_k = rows, cols
        x2d = x.reshape(rows_k, cols_k)
        sb = jnp.stack([scale_rows, shift_rows], axis=-1)             # (rows, 2)
        expand = None
        kernel = _fbn_kernel
    sb_lanes = sb.shape[1]

    # ---- Column tile: full width unless a minimal row stripe already blows the
    #      byte budget; only split when we can stay lane-dense (x128). ----
    if cols_k % 128 == 0 and sub * cols_k * isz > target_block_bytes:
        tile_c = max(128, min(cols_k, _round_down_multiple(
            target_block_bytes // (sub * isz), 128)))
    else:
        tile_c = cols_k   # full-dim block is always legal

    # ---- Row tile: sized in bytes, counting x-in + out + the lane-PADDED
    #      scale/shift block ((tile_r, sb_lanes) pads lanes up to >= 128). ----
    sb_pad_lanes = max(128, pl.cdiv(sb_lanes, 128) * 128)
    per_row_bytes = tile_c * isz * 2 + sb_pad_lanes * 4
    if rows_k <= sub:
        tile_r = rows_k                                               # full-dim block
    else:
        max_r = max(sub, _round_down_multiple(
            2 * target_block_bytes // per_row_bytes, sub))
        tile_r = min(rows_k, max_r)
        if tile_r < rows_k:
            tile_r = max(sub, _round_down_multiple(tile_r, sub))

    # ---- Guarantee >= 2 grid steps per TensorCore (>= 4 total on v7x) for
    #      tensors worth pipelining, so each core overlaps DMA with compute. ----
    min_steps = 2 * num_cores
    if rows_k * cols_k * isz >= (1 << 20) and rows_k > sub:
        col_steps = pl.cdiv(cols_k, tile_c)
        if pl.cdiv(rows_k, tile_r) * col_steps < min_steps:
            want_row_steps = pl.cdiv(min_steps, col_steps)
            cand = max(sub, _round_down_multiple(
                pl.cdiv(rows_k, want_row_steps), sub))
            tile_r = min(tile_r, cand)

    grid = (pl.cdiv(rows_k, tile_r), pl.cdiv(cols_k, tile_c))

    in_specs = [
        pl.BlockSpec((tile_r, tile_c), lambda i, j: (i, j)),
        # scale/shift block ignores the column axis -> reused across j.
        pl.BlockSpec((tile_r, sb_lanes), lambda i, j: (i, 0)),
    ]
    operands = [x2d, sb]
    if expand is not None:
        in_specs.append(pl.BlockSpec((k, cols_k), lambda i, j: (0, 0)))
        operands.append(expand)

    out2d = pl.pallas_call(
        kernel,
        out_shape=jax.ShapeDtypeStruct((rows_k, cols_k), x.dtype),
        grid_spec=pltpu.PrefetchScalarGridSpec(
            num_scalar_prefetch=0,
            grid=grid,
            in_specs=in_specs,
            out_specs=pl.BlockSpec((tile_r, tile_c), lambda i, j: (i, j)),
        ),
        compiler_params=pltpu.CompilerParams(
            dimension_semantics=("parallel", "parallel"),
            vmem_limit_bytes=vmem_limit,
        ),
        # Pure-bandwidth op: one read + one write of x, plus the tiny sb slab.
        cost_estimate=pl.CostEstimate(
            flops=2 * rows * cols,
            transcendentals=0,
            bytes_accessed=2 * rows * cols * isz + rows * 2 * 4,
        ),
    )(*operands)

    return out2d.reshape(N, C, H, W)


def _reference(x, weight, bias, running_mean, running_var, eps=1e-5):
    w4 = weight.reshape(1, -1, 1, 1).astype(jnp.float32)
    b4 = bias.reshape(1, -1, 1, 1).astype(jnp.float32)
    rv4 = running_var.reshape(1, -1, 1, 1).astype(jnp.float32)
    rm4 = running_mean.reshape(1, -1, 1, 1).astype(jnp.float32)
    scale = w4 * jax.lax.rsqrt(rv4 + eps)
    bias_ = b4 - rm4 * scale
    return x.astype(jnp.float32) * scale + bias_


if __name__ == "__main__":
    key = jax.random.PRNGKey(0)

    def make_params(C, k):
        kw, kb, km, kv = jax.random.split(k, 4)
        weight = jnp.ones((C,), jnp.float32) + 0.1 * jax.random.normal(kw, (C,), jnp.float32)
        bias = 0.1 * jax.random.normal(kb, (C,), jnp.float32)
        running_mean = 0.1 * jax.random.normal(km, (C,), jnp.float32)
        running_var = jnp.ones((C,), jnp.float32) + 0.1 * jnp.abs(
            jax.random.normal(kv, (C,), jnp.float32))
        return weight, bias, running_mean, running_var

    cases = [
        # (shape, dtype, atol, rtol)
        ((2, 4, 16, 16), jnp.float32, 1e-5, 1e-5),   # canonical small shape
        ((2, 8, 64, 64), jnp.float32, 1e-5, 1e-5),   # wider rows
        ((4, 64, 64, 64), jnp.float32, 1e-5, 1e-5),  # >=1 MiB: multi-step / megacore path
        ((2, 64, 7, 7), jnp.float32, 1e-5, 1e-5),    # H*W < 128: lane-folding path
        ((2, 4, 32, 32), jnp.bfloat16, 3e-2, 2e-2),  # bf16: 16-sublane handling
    ]

    ok = True
    for idx, (shape, dtype, atol, rtol) in enumerate(cases):
        kp, kx, key = jax.random.split(key, 3)
        N, C, H, W = shape
        x = jax.random.normal(kx, shape, dtype=jnp.float32).astype(dtype)
        weight, bias, running_mean, running_var = make_params(C, kp)
        y = jax.block_until_ready(
            frozen_batch_norm_2d(x, weight, bias, running_mean, running_var))
        y_ref = _reference(x, weight, bias, running_mean, running_var)
        case_ok = bool(
            y.shape == x.shape and y.dtype == x.dtype
            and jnp.allclose(y.astype(jnp.float32), y_ref, atol=atol, rtol=rtol))
        ok &= case_ok

    assert ok
    print("KERNEL_OK")
</pallas_src>

<mosaic_0001>
module attributes {stable_mosaic.version = 11 : i64} {
  func.func @_fbn_kernel(%arg0: i32, %arg1: i32, %arg2: memref<8x256xf32, #tpu.memory_space<vmem>>, %arg3: memref<8x2xf32, #tpu.memory_space<vmem>>, %arg4: memref<8x256xf32, #tpu.memory_space<vmem>>) attributes {dimension_semantics = [#tpu.dimension_semantics<parallel>, #tpu.dimension_semantics<parallel>], iteration_bounds = array<i64: 1, 1>, scalar_prefetch = 0 : i64, scratch_operands = 0 : i64, tpu.core_type = #tpu.core_type<tc>, window_params = [{transform_indices = @transform_0, window_bounds = array<i64: 8, 256>}, {transform_indices = @transform_1, window_bounds = array<i64: 8, 2>}, {transform_indices = @transform_2, window_bounds = array<i64: 8, 256>}]} {
    %c0 = arith.constant 0 : index
    %c0_0 = arith.constant 0 : index
    %0 = vector.load %arg3[%c0, %c0_0] : memref<8x2xf32, #tpu.memory_space<vmem>>, vector<8x2xf32>
    %1 = vector.extract_strided_slice %0 {offsets = [0, 0], sizes = [8, 1], strides = [1, 1]} : vector<8x2xf32> to vector<8x1xf32>
    %2 = vector.extract_strided_slice %0 {offsets = [0, 1], sizes = [8, 1], strides = [1, 1]} : vector<8x2xf32> to vector<8x1xf32>
    %c0_1 = arith.constant 0 : index
    %c0_2 = arith.constant 0 : index
    %3 = vector.load %arg2[%c0_1, %c0_2] : memref<8x256xf32, #tpu.memory_space<vmem>>, vector<8x256xf32>
    %4 = vector.broadcast %1 : vector<8x1xf32> to vector<8x256xf32>
    %5 = arith.mulf %3, %4 : vector<8x256xf32>
    %6 = vector.broadcast %2 : vector<8x1xf32> to vector<8x256xf32>
    %7 = arith.addf %5, %6 : vector<8x256xf32>
    %c0_3 = arith.constant 0 : index
    %c0_4 = arith.constant 0 : index
    %8 = vector.load %arg4[%c0_3, %c0_4] : memref<8x256xf32, #tpu.memory_space<vmem>>, vector<8x256xf32>
    tpu.vector_store %arg4[%c0_3, %c0_4], %7 {strides = array<i32>} : memref<8x256xf32, #tpu.memory_space<vmem>>, vector<8x256xf32>,
    return
  }
  func.func @transform_0(%arg0: i32, %arg1: i32) -> (i32, i32) {
    %c0_i32 = arith.constant 0 : i32
    return %arg0, %arg1 : i32, i32
  }
  func.func @transform_1(%arg0: i32, %arg1: i32) -> (i32, i32) {
    %c0_i32 = arith.constant 0 : i32
    %c0_i32_0 = arith.constant 0 : i32
    return %arg0, %c0_i32 : i32, i32
  }
  func.func @transform_2(%arg0: i32, %arg1: i32) -> (i32, i32) {
    %c0_i32 = arith.constant 0 : i32
    return %arg0, %arg1 : i32, i32
  }
}

</mosaic_0001>

<bundles_post_ra>
// kernel: tpu_custom_call.1
= control target key start
LH: loop header
LB: loop body
LE: loop exit
PB: predicated region body
PF: predicated region fallthrough
CT: control target
= control target key end

     0   :  { %7 = vsyncpa [#allocation3], 0  ;;  %s147_s0 = inlined_call_operand.hbm [shape: f32[8,256], index: 0, kind: input, shape index: {}]   ;;  %s148_s1 = inlined_call_operand.vmem [shape: f32[8,2], index: 1, kind: input, shape index: {}]   ;;  %s149_s2 = inlined_call_operand.hbm [shape: f32[8,256], index: 2, kind: output, shape index: {}]  }
   0x1   :  { %8 = vsyncpa [#allocation4], 0  ;;  %s14_s11 = sshll.u32 %s147_s0, 4  ;;  %s119_s12 = smov [#allocation2]   ;;  %s15_s11 = int_to_ptr.hbm [resolvable:$true] %s14_s11 }
   0x2   :  { %s16_s13 = sshll.u32 %s119_s12, 4  ;;  %s17_s13 = int_to_ptr.vmem [resolvable:$true] %s16_s13 }
   0x3   :  { %19 = dma.hbm_to_vmem [thread:$0]  %s15_s11, 256, %s17_s13, [#allocation3]  }
   0x4   :  { %115 = dma.done.wait [#allocation3], 256  }
   0x5   :  { %116 = vsyncadd [#allocation3], 4294967040  ;;  %v120_v0 = vmov 0   ;;  %v26_v1 = vld [vmem:[%s148_s1] sm:$0xff]  ;;  %v121_v2 = vmov 1   ;;  %v28_v5 = vld [vmem:[#allocation2 + $0x8] sm:$0xff] }
   0x6   :  { %65 = vset.pattern.permute.xlu0 %v120_v0  ;;  %v27_v4 = vld [vmem:[#allocation2] sm:$0xff]  ;;  %s122_s0 = smov [#allocation5]   ;;  %s51_s19 = sshll.u32 %s149_s2, 4  ;;  %s52_s19 = int_to_ptr.hbm [resolvable:$true] %s51_s19 }
   0x7   :  { %31 = vperm.xlu0 %65, %v26_v1   ;;  %s49_s16 = sshll.u32 %s122_s0, 4  ;;  %s50_s16 = int_to_ptr.vmem [resolvable:$true] %s49_s16 }
   0xf   :  { %66 = vset.pattern.permute.xlu0 %v121_v2 }
  0x10   :  { %37 = vperm.xlu0 %66, %v26_v1  }
  0x79   :  { %v32_v3 = vpop.permute.xlu0 %31 }
  0x7a   :  { %v34_v6 = vmul.f32 %v32_v3, %v27_v4  ;;  %v35_v7 = vmul.f32 %v32_v3, %v28_v5 }
  0x82   :  { %v38_v8 = vpop.permute.xlu0 %37 }
  0x83   :  { %v40_v9 = vadd.f32 %v38_v8, %v34_v6  ;;  %v41_v10 = vadd.f32 %v38_v8, %v35_v7 }
  0x85   :  { %42 = vst [vmem:[#allocation5] sm:$0xff] %v40_v9 }
  0x86   :  { %43 = vst [vmem:[#allocation5 + $0x8] sm:$0xff] %v41_v10 }
  0x87   :  { %54 = dma.vmem_to_hbm [thread:$0]  %s50_s16, 256, %s52_s19, [#allocation4]  }
  0x88   :  { %117 = dma.done.wait [#allocation4], 256  }
  0x89   :  { %118 = vsyncadd [#allocation4], 4294967040 }
  0x8a   :  { %59 = vsyncpa [#allocation3], 1 }
  0x8b   :  { %60 = vsyncpa [#allocation4], 1 }

</bundles_post_ra>
